<compile_context>
chip_gen: v7x
topology: tpu7x:2x2x1
jax: 0.10.0
libtpu: 0.0.40
codegen_flags: <defaults>
</compile_context>

<pallas_src>
import math
from functools import partial, lru_cache

import jax
import jax.numpy as jnp
from jax.experimental import pallas as pl
from jax.experimental.pallas import tpu as pltpu

_LANE = 128
_SUBLANE = 8
_COL_CANDIDATES = (4096, 2048, 1024, 512, 256, 128)   # wide, lane-dense slabs


def _round_up(n, m):
    return ((n + m - 1) // m) * m


def _round_down(n, m):
    return (n // m) * m


def _hw_config():
    """Generation-aware block-byte targets and scoped-VMEM limit."""
    kind = ""
    try:
        kind = jax.devices()[0].device_kind.lower()
    except Exception:
        pass
    if "v5" in kind and ("lite" in kind or "5e" in kind):
        # v5e: 16 MiB default scoped VMEM; keep blocks modest.
        return {"ew": 2 << 20, "red": 1 << 20, "vmem": 32 << 20}
    if "v7" in kind:
        # v7x: 64 MiB physical VMEM, 3.2 TB/s HBM -> bigger blocks, capped limit.
        return {"ew": 6 << 20, "red": 3 << 20, "vmem": 48 << 20}
    # v6e / default.
    return {"ew": 4 << 20, "red": 2 << 20, "vmem": 48 << 20}


_CFG = _hw_config()


def _cparams(*sems):
    return pltpu.CompilerParams(dimension_semantics=tuple(sems),
                                vmem_limit_bytes=_CFG["vmem"])


def _fast_recip(s):
    # EUP approximate reciprocal + one Newton-Raphson step: keeps the divide
    # off the VALU critical path while staying ~f32 accurate.
    r = pl.reciprocal(s, approx=True)
    return r * (2.0 - s * r)


# ------------------------------- kernels --------------------------------------

def _sigmoid_kernel(x_ref, o_ref):
    # logistic via EUP tanh (stable for all x)
    x = x_ref[...]
    o_ref[...] = (0.5 * jnp.tanh(0.5 * x) + 0.5).astype(o_ref.dtype)


def _tanh_kernel(x_ref, o_ref):
    o_ref[...] = jnp.tanh(x_ref[...]).astype(o_ref.dtype)


def _softmax_kernel(x_ref, o_ref, *, axis):
    # numerically stable softmax along `axis`; f32 accumulation.
    x = x_ref[...].astype(jnp.float32)
    m = jnp.max(x, axis=axis, keepdims=True)
    e = jnp.exp(x - m)
    s = jnp.sum(e, axis=axis, keepdims=True)
    o_ref[...] = (e * _fast_recip(s)).astype(o_ref.dtype)


def _logsoftmax_kernel(x_ref, o_ref, *, axis):
    x = x_ref[...].astype(jnp.float32)
    m = jnp.max(x, axis=axis, keepdims=True)
    z = x - m
    lse = jnp.log(jnp.sum(jnp.exp(z), axis=axis, keepdims=True))
    o_ref[...] = (z - lse).astype(o_ref.dtype)


def _segmented_softmax_kernel(x_ref, o_ref, *, seg, log, roll_fwd):
    # softmax / logsoftmax over independent length-`seg` segments packed along
    # the lane axis of a (tr, G*seg) block.  The per-segment max / sum are
    # computed with a log2(seg)-step roll butterfly: every lane ends up holding
    # its segment's reduction, so loads, exp and stores all stay lane-dense.
    x = x_ref[...].astype(jnp.float32)
    w = x.shape[-1]
    axis = x.ndim - 1
    lane = jax.lax.broadcasted_iota(jnp.int32, x.shape, axis)

    def seg_allreduce(v, combine):
        o = 1
        while o < seg:
            sa, sb = ((w - o, o) if roll_fwd else (o, w - o))
            up = pltpu.roll(v, shift=sa, axis=axis)    # v[i + o]
            dn = pltpu.roll(v, shift=sb, axis=axis)    # v[i - o]
            # partner of lane i is i ^ o; o < seg so it never leaves the segment
            v = combine(v, jnp.where((lane & o) != 0, dn, up))
            o *= 2
        return v

    m = seg_allreduce(x, jnp.maximum)
    z = x - m
    e = jnp.exp(z)
    s = seg_allreduce(e, jnp.add)
    if log:
        o_ref[...] = (z - jnp.log(s)).astype(o_ref.dtype)
    else:
        o_ref[...] = (e * _fast_recip(s)).astype(o_ref.dtype)


def _argmax_sublane_kernel(x_ref, o_ref):
    # argmax over the sublane axis (-2) of a (TB, C, TL) block; the (TB, TL)
    # output stays lane-dense.  First-occurrence tie-break (matches torch).
    # TODO(synk): NaN handling differs from torch (NaN is not treated as max).
    x = x_ref[...]
    c = x.shape[-2]
    idx = jax.lax.broadcasted_iota(jnp.int32, x.shape, x.ndim - 2)
    maxv = jnp.max(x, axis=-2, keepdims=True)
    o_ref[...] = jnp.min(jnp.where(x == maxv, idx, jnp.int32(c)), axis=-2)


def _argmax_lane_kernel(x_ref, o_ref):
    # argmax over the last (lane) axis of a (TR, C) block -> (TR, 1) indices.
    # Consumes the HBM layout as-is (no wrapper transpose).
    x = x_ref[...]
    c = x.shape[-1]
    idx = jax.lax.broadcasted_iota(jnp.int32, x.shape, x.ndim - 1)
    maxv = jnp.max(x, axis=-1, keepdims=True)
    o_ref[...] = jnp.min(jnp.where(x == maxv, idx, jnp.int32(c)),
                         axis=-1, keepdims=True)


def _argmax_partial_kernel(x_ref, v_ref, i_ref, *, total_rows, pad_val):
    # Phase 1 of the flat argmax: per-block, per-lane (max value, first global
    # row achieving it).  Only VPU sublane folds here; all cross-lane work is
    # deferred to the tiny phase-2 reduce, so this stays hidden under DMA.
    x = x_ref[...]
    tr, _ = x.shape
    row = jax.lax.broadcasted_iota(jnp.int32, x.shape, 0)
    grow = pl.program_id(0) * tr + row                        # global row index
    if total_rows % tr != 0:
        # mask the ragged last block so uninitialized rows can never win
        x = jnp.where(grow < total_rows, x, pad_val)
    vbest = jnp.max(x, axis=0, keepdims=True)                 # (1, cols)
    rbest = jnp.min(jnp.where(x == vbest, grow, jnp.int32(total_rows)),
                    axis=0, keepdims=True)                    # (1, cols)
    v_ref[...] = vbest[None]
    i_ref[...] = rbest[None]


# ------------------------------ helpers ----------------------------------------

@lru_cache(maxsize=None)
def _roll_is_jnp_like():
    """Probe pltpu.roll's rotation convention once (outside any jit trace).
    True  -> jnp.roll convention (out[i] = in[(i - shift) % n])
    False -> opposite convention
    None  -> probe failed; disable the packed-softmax path."""
    def k(x_ref, o_ref):
        o_ref[...] = pltpu.roll(x_ref[...], shift=1, axis=1)
    try:
        x = jnp.arange(_LANE, dtype=jnp.int32).reshape(1, _LANE)
        y = pl.pallas_call(
            k, out_shape=jax.ShapeDtypeStruct((1, _LANE), jnp.int32))(x)
        v = int(jax.device_get(y)[0, 0])
        if v == _LANE - 1:
            return True
        if v == 1:
            return False
        return None
    except Exception:
        return None


def _as_2d_slab(x, pad_value):
    """Flatten x to a lane-dense (rows, cols) slab.  Prefers a `cols` that
    divides x.size so no HBM padding / slicing pass is needed."""
    n = x.size
    xf = x.reshape(-1)
    for cols in _COL_CANDIDATES:
        if n % cols == 0 and n >= cols:
            return xf.reshape(n // cols, cols), n // cols, cols, n, False
    # TODO(synk): extra HBM pad pass only when no lane-dense width divides n.
    cols = _LANE
    n_pad = _round_up(n, cols)
    xf = jnp.pad(xf, (0, n_pad - n), constant_values=pad_value)
    return xf.reshape(n_pad // cols, cols), n_pad // cols, cols, n, True


# ------------------------------ wrappers ---------------------------------------

def _elementwise(kernel, x):
    """Stream a lane-dense (rows, cols) slab through `kernel` in row tiles."""
    if x.size == 0:
        return x
    orig_shape = x.shape
    x2d, rows, cols, n, padded = _as_2d_slab(x, 0)
    itemsize = x.dtype.itemsize
    budget = max(1, _CFG["ew"] // (cols * itemsize))       # rows per block
    if rows <= budget or rows <= _SUBLANE:
        tr = rows
    else:
        tr = max(_SUBLANE, _round_down(budget, _SUBLANE))

    y2d = pl.pallas_call(
        kernel,
        out_shape=jax.ShapeDtypeStruct((rows, cols), x.dtype),
        grid=(pl.cdiv(rows, tr),),
        in_specs=[pl.BlockSpec((tr, cols), lambda i: (i, 0))],
        out_specs=pl.BlockSpec((tr, cols), lambda i: (i, 0)),
        compiler_params=_cparams("parallel"),
    )(x2d)

    y = y2d.reshape(-1)
    if padded:
        y = y[:n]
    return y.reshape(orig_shape)


def _softmax_like(x, dim, log):
    """softmax / logsoftmax along `dim`, no wrapper pad/slice/transpose passes."""
    if x.size == 0:
        return x
    ndim = x.ndim
    dim = dim % ndim
    shape = x.shape
    C = shape[dim]
    lead = math.prod(shape[:dim]) if dim > 0 else 1
    trail = math.prod(shape[dim + 1:]) if dim < ndim - 1 else 1
    budget = max(_LANE, _CFG["red"] // 4)          # elements; f32 temps dominate
    kernel = _logsoftmax_kernel if log else _softmax_kernel

    if trail == 1:
        rows = lead

        # small power-of-two C: pack G rows into the lane axis so loads, exp and
        # stores stay lane-dense (avoids the masked-vst / 8x vreg penalty).
        use_packed = (1 <= C < _LANE) and ((C & (C - 1)) == 0)
        if use_packed:
            roll_fwd = _roll_is_jnp_like()
            q = _LANE // C
            use_packed = (roll_fwd is not None) and rows % q == 0
        if use_packed:
            G = q
            cap = max(q, 2048 // C)
            while G * 2 <= cap and rows % (G * 2) == 0:
                G *= 2
            W = G * C
            rows_p = rows // G
            x2 = x.reshape(rows_p, W)
            if rows_p * W <= budget or rows_p <= _SUBLANE:
                tr = rows_p
            else:
                tr = max(_SUBLANE,
                         _round_down(max(1, budget // W), _SUBLANE))
            y2 = pl.pallas_call(
                partial(_segmented_softmax_kernel, seg=C, log=log,
                        roll_fwd=roll_fwd),
                out_shape=jax.ShapeDtypeStruct((rows_p, W), x.dtype),
                grid=(pl.cdiv(rows_p, tr),),
                in_specs=[pl.BlockSpec((tr, W), lambda i: (i, 0))],
                out_specs=pl.BlockSpec((tr, W), lambda i: (i, 0)),
                compiler_params=_cparams("parallel"),
            )(x2)
            return y2.reshape(shape)

        # TODO(synk): C that is neither a small power of two nor a multiple of
        # 128 falls back to a narrow-lane block (partially masked stores).
        x2 = x.reshape(rows, C)
        if rows * C <= budget or rows <= _SUBLANE:
            tr = rows
        else:
            tr = max(_SUBLANE, _round_down(max(1, budget // C), _SUBLANE))
        y2 = pl.pallas_call(
            partial(kernel, axis=-1),
            out_shape=jax.ShapeDtypeStruct((rows, C), x.dtype),
            grid=(pl.cdiv(rows, tr),),
            in_specs=[pl.BlockSpec((tr, C), lambda i: (i, 0))],
            out_specs=pl.BlockSpec((tr, C), lambda i: (i, 0)),
            compiler_params=_cparams("parallel"),
        )(x2)
        return y2.reshape(shape)

    # reduce over the sublane axis of a (lead, C, trail) view; lane axis dense.
    x3 = x.reshape(lead, C, trail)
    c_pad = _round_up(C, _SUBLANE)                 # account for sublane padding
    tl_budget = max(_LANE, _round_down(max(1, budget // c_pad), _LANE))
    TL = trail if trail <= tl_budget else tl_budget
    tb_budget = max(1, budget // (c_pad * TL))
    TB = lead if lead <= tb_budget else tb_budget

    y3 = pl.pallas_call(
        partial(kernel, axis=-2),
        out_shape=jax.ShapeDtypeStruct((lead, C, trail), x.dtype),
        grid=(pl.cdiv(lead, TB), pl.cdiv(trail, TL)),
        in_specs=[pl.BlockSpec((TB, C, TL), lambda i, j: (i, 0, j))],
        out_specs=pl.BlockSpec((TB, C, TL), lambda i, j: (i, 0, j)),
        compiler_params=_cparams("parallel", "parallel"),
    )(x3)
    return y3.reshape(shape)


def _argmax_flat(x):
    """torch.argmax(x) with dim=None: two-phase parallel flattened argmax."""
    # TODO(synk): torch returns int64; int32 flat indices overflow for tensors
    # with >= 2**31 elements.  NaN is not treated as the maximum (torch is).
    if jnp.issubdtype(x.dtype, jnp.floating):
        pad_val = float('-inf')
    elif jnp.issubdtype(x.dtype, jnp.bool_):
        pad_val = False
    else:
        pad_val = int(jnp.iinfo(x.dtype).min)

    x2d, rows, cols, n, _ = _as_2d_slab(x, pad_val)
    itemsize = x.dtype.itemsize
    budget = max(1, _CFG["ew"] // (cols * max(itemsize, 4)))
    if rows <= budget or rows <= _SUBLANE:
        tr = rows
    else:
        tr = max(_SUBLANE, _round_down(budget, _SUBLANE))
    nblk = pl.cdiv(rows, tr)

    v_part, i_part = pl.pallas_call(
        partial(_argmax_partial_kernel, total_rows=rows, pad_val=pad_val),
        out_shape=(jax.ShapeDtypeStruct((nblk, 1, cols), x.dtype),
                   jax.ShapeDtypeStruct((nblk, 1, cols), jnp.int32)),
        grid=(nblk,),
        in_specs=[pl.BlockSpec((tr, cols), lambda i: (i, 0))],
        out_specs=(pl.BlockSpec((1, 1, cols), lambda i: (i, 0, 0)),
                   pl.BlockSpec((1, 1, cols), lambda i: (i, 0, 0))),
        compiler_params=_cparams("parallel"),
    )(x2d)

    # phase 2: tiny cross-block / cross-lane reduce on nblk*cols partials.
    vals = v_part.reshape(-1)
    rows_idx = i_part.reshape(-1)
    lane = jnp.broadcast_to(jnp.arange(cols, dtype=jnp.int32),
                            (nblk, 1, cols)).reshape(-1)
    flat = rows_idx * jnp.int32(cols) + lane
    limit = jnp.int32(min(n, 2 ** 31 - 1))
    m = jnp.max(vals)
    return jnp.min(jnp.where(vals == m, flat, limit))


def _argmax_dim(x, dim):
    """torch.argmax(x, dim) without wrapper transposes / pads."""
    # TODO(synk): torch.argmax returns int64; TPU kernels emit int32 indices.
    ndim = x.ndim
    dim = dim % ndim
    out_shape = x.shape[:dim] + x.shape[dim + 1:]
    if ndim == 1:
        return _argmax_flat(x)
    if x.size == 0:
        return jnp.zeros(out_shape, jnp.int32)

    budget = max(_LANE, _CFG["red"] // 4)

    if dim == ndim - 1:
        # lane-axis argmax: consume the HBM layout as-is (no jnp.swapaxes pass).
        C = x.shape[-1]
        rows = math.prod(x.shape[:-1])
        x2 = x.reshape(rows, C)
        if rows * C <= budget or rows <= _SUBLANE:
            tr = rows
        else:
            tr = max(_SUBLANE, _round_down(max(1, budget // C), _SUBLANE))
        y = pl.pallas_call(
            _argmax_lane_kernel,
            out_shape=jax.ShapeDtypeStruct((rows, 1), jnp.int32),
            grid=(pl.cdiv(rows, tr),),
            in_specs=[pl.BlockSpec((tr, C), lambda i: (i, 0))],
            out_specs=pl.BlockSpec((tr, 1), lambda i: (i, 0)),
            compiler_params=_cparams("parallel"),
        )(x2)
        return y.reshape(out_shape)

    # sublane-axis argmax with a lane-dense (lead, trail) output.
    shape = x.shape
    C = shape[dim]
    lead = math.prod(shape[:dim]) if dim > 0 else 1
    trail = math.prod(shape[dim + 1:])
    x3 = x.reshape(lead, C, trail)
    c_pad = _round_up(C, _SUBLANE)
    tl_budget = max(_LANE, _round_down(max(1, budget // c_pad), _LANE))
    TL = trail if trail <= tl_budget else tl_budget
    tb_budget = max(1, budget // (c_pad * TL))
    if lead <= tb_budget or lead <= _SUBLANE:
        TB = lead
    else:
        TB = max(_SUBLANE, _round_down(tb_budget, _SUBLANE))

    y2 = pl.pallas_call(
        _argmax_sublane_kernel,
        out_shape=jax.ShapeDtypeStruct((lead, trail), jnp.int32),
        grid=(pl.cdiv(lead, TB), pl.cdiv(trail, TL)),
        in_specs=[pl.BlockSpec((TB, C, TL), lambda i, j: (i, 0, j))],
        out_specs=pl.BlockSpec((TB, TL), lambda i, j: (i, j)),
        compiler_params=_cparams("parallel", "parallel"),
    )(x3)
    return y2.reshape(out_shape)


# ----------------------------- Activation module --------------------------------

class Activation:
    """JAX/Pallas port of segmentation_models.pytorch's Activation."""

    def __init__(self, name, **params):
        if name in ('softmax', 'logsoftmax', 'softmax2d'):
            _roll_is_jnp_like()   # probe roll semantics eagerly (outside jit)

        if name is None or name == 'identity':
            self._fn = lambda x: x            # true no-op: zero HBM traffic
        elif name == 'sigmoid':
            self._fn = jax.jit(lambda x: _elementwise(_sigmoid_kernel, x))
        elif name == 'softmax2d':
            self._fn = jax.jit(lambda x: _softmax_like(x, dim=1, log=False))
        elif name == 'softmax':
            dim = params.get('dim', -1)       # torch's dim=None default is deprecated
            self._fn = jax.jit(lambda x: _softmax_like(x, dim=dim, log=False))
        elif name == 'logsoftmax':
            dim = params.get('dim', -1)
            self._fn = jax.jit(lambda x: _softmax_like(x, dim=dim, log=True))
        elif name == 'tanh':
            self._fn = jax.jit(lambda x: _elementwise(_tanh_kernel, x))
        elif name == 'argmax':
            dim = params.get('dim', None)
            if dim is None:
                self._fn = jax.jit(_argmax_flat)
            else:
                self._fn = jax.jit(lambda x: _argmax_dim(x, dim))
        elif name == 'argmax2d':
            self._fn = jax.jit(lambda x: _argmax_dim(x, 1))
        elif callable(name):
            # TODO(synk): arbitrary user callables cannot be auto-lowered to Pallas.
            self._fn = name(**params)
        else:
            raise ValueError(
                'Activation should be callable/sigmoid/softmax/logsoftmax/tanh/'
                'None; got {}'.format(name))

    def __call__(self, x):
        return self._fn(x)


# ----------------------------------- main ----------------------------------------

if __name__ == "__main__":
    key = jax.random.PRNGKey(0)
    x = jax.random.normal(key, (2, 4, 16, 16), dtype=jnp.float32)  # NCHW

    ok = True

    y = jax.block_until_ready(Activation('identity')(x))
    ok &= bool(jnp.array_equal(y, x))

    y = jax.block_until_ready(Activation('sigmoid')(x))
    ok &= bool(jnp.allclose(y, jax.nn.sigmoid(x), atol=1e-5))

    y = jax.block_until_ready(Activation('tanh')(x))
    ok &= bool(jnp.allclose(y, jnp.tanh(x), atol=1e-5))

    y = jax.block_until_ready(Activation('softmax2d')(x))
    ok &= bool(jnp.allclose(y, jax.nn.softmax(x, axis=1), atol=1e-4))

    y = jax.block_until_ready(Activation('softmax', dim=-1)(x))
    ok &= bool(jnp.allclose(y, jax.nn.softmax(x, axis=-1), atol=1e-4))

    y = jax.block_until_ready(Activation('logsoftmax', dim=1)(x))
    ok &= bool(jnp.allclose(y, jax.nn.log_softmax(x, axis=1), atol=1e-4))

    y = jax.block_until_ready(Activation('argmax2d')(x))
    ok &= (y.shape == (2, 16, 16)) and bool(
        jnp.array_equal(y, jnp.argmax(x, axis=1).astype(jnp.int32)))

    y = jax.block_until_ready(Activation('argmax')(x))
    ok &= (y.shape == ()) and bool(
        jnp.array_equal(y, jnp.argmax(x).astype(jnp.int32)))

    y = jax.block_until_ready(Activation('argmax', dim=-1)(x))
    ok &= (y.shape == (2, 4, 16)) and bool(
        jnp.array_equal(y, jnp.argmax(x, axis=-1).astype(jnp.int32)))

    if not ok:
        raise SystemExit("mismatch vs reference")
    print("KERNEL_OK")
</pallas_src>

<mosaic_0001>
module attributes {stable_mosaic.version = 11 : i64} {
  func.func @_sigmoid_kernel(%arg0: i32, %arg1: memref<1x2048xf32, #tpu.memory_space<vmem>>, %arg2: memref<1x2048xf32, #tpu.memory_space<vmem>>) attributes {dimension_semantics = [#tpu.dimension_semantics<parallel>], iteration_bounds = array<i64: 1>, scalar_prefetch = 0 : i64, scratch_operands = 0 : i64, tpu.core_type = #tpu.core_type<tc>, window_params = [{transform_indices = @transform_0, window_bounds = array<i64: 1, 2048>}, {transform_indices = @transform_1, window_bounds = array<i64: 1, 2048>}]} {
    %c0 = arith.constant 0 : index
    %c0_0 = arith.constant 0 : index
    %0 = vector.load %arg1[%c0, %c0_0] : memref<1x2048xf32, #tpu.memory_space<vmem>>, vector<1x2048xf32>
    %cst = arith.constant 5.000000e-01 : f32
    %1 = vector.broadcast %cst : f32 to vector<1x2048xf32>
    %2 = arith.mulf %1, %0 : vector<1x2048xf32>
    %3 = math.tanh %2 : vector<1x2048xf32>
    %cst_1 = arith.constant 5.000000e-01 : f32
    %4 = vector.broadcast %cst_1 : f32 to vector<1x2048xf32>
    %5 = arith.mulf %4, %3 : vector<1x2048xf32>
    %cst_2 = arith.constant 5.000000e-01 : f32
    %6 = vector.broadcast %cst_2 : f32 to vector<1x2048xf32>
    %7 = arith.addf %5, %6 : vector<1x2048xf32>
    %c0_3 = arith.constant 0 : index
    %c0_4 = arith.constant 0 : index
    %8 = vector.load %arg2[%c0_3, %c0_4] : memref<1x2048xf32, #tpu.memory_space<vmem>>, vector<1x2048xf32>
    tpu.vector_store %arg2[%c0_3, %c0_4], %7 {strides = array<i32>} : memref<1x2048xf32, #tpu.memory_space<vmem>>, vector<1x2048xf32>,
    return
  }
  func.func @transform_0(%arg0: i32) -> (i32, i32) {
    %c0_i32 = arith.constant 0 : i32
    %c0_i32_0 = arith.constant 0 : i32
    return %arg0, %c0_i32 : i32, i32
  }
  func.func @transform_1(%arg0: i32) -> (i32, i32) {
    %c0_i32 = arith.constant 0 : i32
    %c0_i32_0 = arith.constant 0 : i32
    return %arg0, %c0_i32 : i32, i32
  }
}

</mosaic_0001>

<bundles_post_ra>
// kernel: _lambda_.1
= control target key start
LH: loop header
LB: loop body
LE: loop exit
PB: predicated region body
PF: predicated region fallthrough
CT: control target
= control target key end

     0   :  { %s50_s0 = inlined_call_operand.vmem [shape: f32[1,2048], index: 0, kind: input, shape index: {}]   ;;  %s51_s1 = inlined_call_operand.vmem [shape: f32[1,2048], index: 1, kind: output, shape index: {}]  }
   0x1   :  { %v8_v0 = vld [vmem:[%s50_s0] sm:$0xff]  ;;  %v9_v1 = vld [vmem:[%s50_s0 + $0x8] sm:$0xff] }
   0x2   :  { %v10_v2 = vmul.f32 0.5, %v8_v0  ;;  %v11_v3 = vmul.f32 0.5, %v9_v1 }
   0x4   :  { %24 = vtanh.f32 %v10_v2 }
   0x5   :  { %26 = vtanh.f32 %v11_v3 }
   0xe   :  { %v25_v4 = vpop.eup %24 }
   0xf   :  { %v27_v5 = vpop.eup %26  ;;  %v14_v6 = vmul.f32 0.5, %v25_v4 }
  0x10   :  { %v15_v7 = vmul.f32 0.5, %v27_v5 }
  0x11   :  { %v16_v8 = vadd.f32 0.5, %v14_v6 }
  0x12   :  { %v17_v9 = vadd.f32 0.5, %v15_v7 }
  0x13   :  { %18 = vst [vmem:[%s51_s1] sm:$0xff] %v16_v8 }
  0x14   :  { %19 = vst [vmem:[%s51_s1 + $0x8] sm:$0xff] %v17_v9 }

</bundles_post_ra>
